<compile_context>
chip_gen: v7x
topology: tpu7x:2x2x1
jax: 0.10.0
libtpu: 0.0.40
codegen_flags: <defaults>
</compile_context>

<pallas_src>
import math

import jax
import jax.numpy as jnp
from jax.experimental import pallas as pl
from jax.experimental.pallas import tpu as pltpu

_SHIFT = math.log(2.0)
_LANES = 128

# ~6 MiB blocks -> peak scoped VMEM ~= 4 x block ~= 24 MiB (double-buffered in + out).
# Within v7x's 64 MiB/TC and well within v5e/v6e's 128 MiB once the scoped limit is raised.
_MAX_BLOCK_BYTES = 6 * 1024 * 1024
_VMEM_LIMIT_BYTES = 40 << 20

# Minimum grid steps when the array is large enough: 4 is even (v7x: 2 steps per TC) and
# enough for double-buffered DMA pipelining on 1-TC chips, without shrinking blocks the
# way the old MIN_GRID=8 clamp did on mid-size activations.
_MIN_GRID = 4

# Below this element count a fused XLA elementwise op beats pallas_call launch + DMA-setup
# overhead (on v7x's 3.2 TB/s HBM the crossover sits even higher; callers may raise it).
_SMALL_FALLBACK_ELEMS = 64 * 1024


def _cdiv(a: int, b: int) -> int:
    return -(-a // b)


def _round_up(x: int, m: int) -> int:
    return _cdiv(x, m) * m


def _shifted_softplus_kernel(x_ref, o_ref):
    # NOTE: the partial (edge) block reads VMEM rows beyond the valid range; exp/log1p on
    # that garbage may produce inf/NaN in lanes whose output is then dropped by the masked
    # store. Benign -- do not add NaN debug_checks or block-wide reductions here.
    xf = x_ref[...].astype(jnp.float32)
    # Numerically stable softplus: max(x, 0) + log1p(exp(-|x|)).
    sp = jnp.maximum(xf, 0.0) + jnp.log1p(jnp.exp(-jnp.abs(xf)))
    o_ref[...] = (sp - _SHIFT).astype(o_ref.dtype)


def _run_pallas_aligned(x_flat_aligned: jax.Array, rows: int, dtype) -> jax.Array:
    """Run the kernel on a (rows * 128)-element lane-aligned flat chunk; returns (rows, 128)."""
    itemsize = jnp.dtype(dtype).itemsize
    sublane = max(8, 32 // itemsize)  # packed-sublane granule: f32->8, bf16->16, int8->32
    x2d = x_flat_aligned.reshape(rows, _LANES)

    # Largest tile (multiple of the sublane granule) under the block-byte cap ...
    max_rows_by_bytes = max(
        sublane, (_MAX_BLOCK_BYTES // (_LANES * itemsize)) // sublane * sublane
    )
    # ... but keep at least _MIN_GRID grid steps when the array allows it.
    rows_for_min_grid = max(sublane, _round_up(_cdiv(rows, _MIN_GRID), sublane))
    tile_rows = min(max_rows_by_bytes, rows_for_min_grid)
    grid_n = _cdiv(rows, tile_rows)

    # v7x shards the parallel grid axis across its 2 TensorCores; prefer an even step
    # count so neither core idles on the last block (best-effort, cheap).
    if grid_n > 1 and grid_n % 2 == 1:
        alt_tile = max(sublane, _round_up(_cdiv(rows, grid_n + 1), sublane))
        alt_grid = _cdiv(rows, alt_tile)
        if alt_grid % 2 == 0 and alt_tile * _LANES * itemsize <= _MAX_BLOCK_BYTES:
            tile_rows, grid_n = alt_tile, alt_grid

    n = rows * _LANES
    cost = pl.CostEstimate(
        flops=4 * n,               # max, abs, neg, add/sub per element (approx.)
        transcendentals=2 * n,     # exp + log1p
        bytes_accessed=2 * n * itemsize,
    )

    return pl.pallas_call(
        _shifted_softplus_kernel,
        out_shape=jax.ShapeDtypeStruct((rows, _LANES), dtype),
        grid_spec=pltpu.PrefetchScalarGridSpec(
            num_scalar_prefetch=0,
            grid=(grid_n,),  # partial edge block handled by Pallas via masked stores
            in_specs=[pl.BlockSpec((tile_rows, _LANES), lambda i: (i, 0))],
            out_specs=pl.BlockSpec((tile_rows, _LANES), lambda i: (i, 0)),
        ),
        compiler_params=pltpu.CompilerParams(
            dimension_semantics=("parallel",),
            vmem_limit_bytes=_VMEM_LIMIT_BYTES,
        ),
        cost_estimate=cost,
    )(x2d)


def shifted_softplus(x: jax.Array, *, min_pallas_elems: int = _SMALL_FALLBACK_ELEMS) -> jax.Array:
    orig_shape = x.shape
    orig_dtype = x.dtype
    total = x.size

    # Small-size fallback: pallas_call launch + DMA setup dominates for tiny activations.
    if total < min_pallas_elems:
        return (jax.nn.softplus(x.astype(jnp.float32)) - _SHIFT).astype(orig_dtype)

    x_flat = jnp.ravel(x)
    rows = total // _LANES
    aligned = rows * _LANES

    if aligned == total:
        # Common case: no padding, no extra HBM passes.
        out2d = _run_pallas_aligned(x_flat, rows, orig_dtype)
        return out2d.reshape(orig_shape)

    # Unaligned case: run the kernel only on the lane-aligned prefix and compute the
    # (<128-element) tail with plain XLA, then stitch. This replaces the old
    # pad-whole-input + slice-whole-output path (one extra output pass instead of two).
    head = _run_pallas_aligned(x_flat[:aligned], rows, orig_dtype).reshape(-1)
    tail = x_flat[aligned:]
    tail_out = (jax.nn.softplus(tail.astype(jnp.float32)) - _SHIFT).astype(orig_dtype)
    return jnp.concatenate([head, tail_out]).reshape(orig_shape)


def shifted_softplus_ref(x: jax.Array) -> jax.Array:
    return jax.nn.softplus(x) - _SHIFT


if __name__ == "__main__":
    key = jax.random.PRNGKey(0)
    k1, k2, k3, k4 = jax.random.split(key, 4)

    # 1) Tiny module-scale input -> small-size XLA fallback path.
    x_small = jax.random.normal(k1, (2, 4, 16, 16), dtype=jnp.float32) * 3.0
    y_small = jax.block_until_ready(shifted_softplus(x_small))
    assert y_small.shape == x_small.shape and y_small.dtype == x_small.dtype
    assert jnp.allclose(y_small, shifted_softplus_ref(x_small), atol=1e-5, rtol=1e-5)

    # 2) Moderate, lane-aligned input (512 KiB) -> single Pallas pass, no pad/slice copies.
    x = jax.random.normal(k2, (2, 4, 128, 128), dtype=jnp.float32) * 3.0
    y = jax.block_until_ready(shifted_softplus(x))
    assert y.shape == x.shape and y.dtype == x.dtype
    assert jnp.allclose(y, shifted_softplus_ref(x), atol=1e-5, rtol=1e-5)

    # 3) total % 128 != 0 -> Pallas kernel on the aligned prefix + XLA on the 64-elem tail.
    x_odd = jax.random.normal(k3, (3, 5, 77, 64), dtype=jnp.float32) * 3.0
    y_odd = jax.block_until_ready(shifted_softplus(x_odd))
    assert y_odd.shape == x_odd.shape and y_odd.dtype == x_odd.dtype
    assert jnp.allclose(y_odd, shifted_softplus_ref(x_odd), atol=1e-5, rtol=1e-5)

    # 4) bf16 input -> exercises the 16-row packed-sublane tile rounding.
    x_bf16 = (jax.random.normal(k4, (2, 4, 128, 130), dtype=jnp.float32) * 3.0).astype(jnp.bfloat16)
    y_bf16 = jax.block_until_ready(shifted_softplus(x_bf16))
    assert y_bf16.shape == x_bf16.shape and y_bf16.dtype == jnp.bfloat16
    ref_bf16 = (jax.nn.softplus(x_bf16.astype(jnp.float32)) - _SHIFT).astype(jnp.bfloat16)
    assert jnp.allclose(
        y_bf16.astype(jnp.float32), ref_bf16.astype(jnp.float32), atol=5e-2, rtol=2e-2
    )

    print("KERNEL_OK")
</pallas_src>

<mosaic_0001>
module attributes {stable_mosaic.version = 11 : i64} {
  func.func @_shifted_softplus_kernel(%arg0: i32, %arg1: memref<256x128xf32, #tpu.memory_space<vmem>>, %arg2: memref<256x128xf32, #tpu.memory_space<vmem>>) attributes {dimension_semantics = [#tpu.dimension_semantics<parallel>], iteration_bounds = array<i64: 4>, scalar_prefetch = 0 : i64, scratch_operands = 0 : i64, tpu.core_type = #tpu.core_type<tc>, window_params = [{transform_indices = @transform_0, window_bounds = array<i64: 256, 128>}, {transform_indices = @transform_1, window_bounds = array<i64: 256, 128>}]} {
    %c0 = arith.constant 0 : index
    %c0_0 = arith.constant 0 : index
    %0 = vector.load %arg1[%c0, %c0_0] : memref<256x128xf32, #tpu.memory_space<vmem>>, vector<256x128xf32>
    %cst = arith.constant 0.000000e+00 : f32
    %1 = vector.broadcast %cst : f32 to vector<256x128xf32>
    %2 = arith.maximumf %0, %1 : vector<256x128xf32>
    %3 = math.absf %0 : vector<256x128xf32>
    %cst_1 = arith.constant 0.000000e+00 : f32
    %4 = vector.broadcast %cst_1 : f32 to vector<256x128xf32>
    %5 = arith.subf %4, %3 : vector<256x128xf32>
    %6 = math.exp %5 : vector<256x128xf32>
    %7 = math.log1p %6 : vector<256x128xf32>
    %8 = arith.addf %2, %7 : vector<256x128xf32>
    %cst_2 = arith.constant 0.693147182 : f32
    %9 = vector.broadcast %cst_2 : f32 to vector<256x128xf32>
    %10 = arith.subf %8, %9 : vector<256x128xf32>
    %c0_3 = arith.constant 0 : index
    %c0_4 = arith.constant 0 : index
    %11 = vector.load %arg2[%c0_3, %c0_4] : memref<256x128xf32, #tpu.memory_space<vmem>>, vector<256x128xf32>
    tpu.vector_store %arg2[%c0_3, %c0_4], %10 {strides = array<i32>} : memref<256x128xf32, #tpu.memory_space<vmem>>, vector<256x128xf32>,
    return
  }
  func.func @transform_0(%arg0: i32) -> (i32, i32) {
    %c0_i32 = arith.constant 0 : i32
    %c0_i32_0 = arith.constant 0 : i32
    return %arg0, %c0_i32 : i32, i32
  }
  func.func @transform_1(%arg0: i32) -> (i32, i32) {
    %c0_i32 = arith.constant 0 : i32
    %c0_i32_0 = arith.constant 0 : i32
    return %arg0, %c0_i32 : i32, i32
  }
}

</mosaic_0001>

<bundles_post_ra>
// kernel: tpu_custom_call.1
= control target key start
LH: loop header
LB: loop body
LE: loop exit
PB: predicated region body
PF: predicated region fallthrough
CT: control target
= control target key end

     0   :  { %6 = vsyncpa [#allocation3], 0  ;;  %s1804_s0 = inlined_call_operand.hbm [shape: f32[1024,128], index: 0, kind: input, shape index: {}]   ;;  %s1805_s1 = inlined_call_operand.hbm [shape: f32[1024,128], index: 1, kind: output, shape index: {}]  }
   0x1   :  { %8 = vsyncpa [#allocation3 + $0x1], 0 }
   0x2   :  { %9 = vsyncpa [#allocation4], 0 }
   0x3   :  { %11 = vsyncpa [#allocation4 + $0x1], 0  ;;  %s1140_s6 = smov 0   ;;  %s1142_s7 = smov 0  }
   0x4   :  { %s1144_s8 = smov 0   ;;  %s1146_s9 = smov 0  }
   0x5 LB: > { %s1161_s10 = sadd.s32 4294967295, %s1122_s9   ;;  %s800_s11 = sadd.s32 4294967294, %s1122_s9   ;;  %s1122_s9 = sphi %s1146_s9, %s1879_s9   ;;  %s1118_s8 = sphi %s1144_s8, %s1878_s8   ;;  %s1114_s7 = sphi %s1142_s7, %s1877_s7   ;;  %s1110_s6 = sphi %s1140_s6, %s1876_s6  }
   0x6   : > { %s1165_s12 = sadd.s32 1, %s1122_s9   ;;  %s24_s13 = sadd.s32 1, %s1118_s8 }
   0x7   : > { %s21_s14 = ssub.s32 %s1122_s9, %s1165_s12  ;;  %p31_p0 = scmp.ne.s32.totalorder %s1118_s8, %s1114_s7 }
   0x8   : > { %p22_p1 = scmp.eq.s32.totalorder %s21_s14, 0  ;;  %p32_p2 = scmp.eq.s32.totalorder %s1122_s9, 0 }
   0x9   : > { %p37_p3 = scmp.ne.s32.totalorder %s1114_s7, %s1110_s6  ;;  %p38_p4 = scmp.eq.s32.totalorder %s1161_s10, 0 }
   0xa   : > { %s1177_s15 = scalar_select %p22_p1, %s1118_s8, %s24_s13  }
   0xb   : > { %p1179_p5 = por %p32_p2, %p31_p0  ;;  %p1183_p6 = por %p38_p4, %p37_p3 }
   0xc   : > { %p61_p7 = scmp.eq.s32.totalorder %s1161_s10, 3  ;;  %p67_p8 = scmp.eq.s32.totalorder %s800_s11, 3 }
   0xd   : > { %p860_p9 = scmp.lt.s32.totalorder %s1122_s9, 4  ;;  %s87_s20 = sand.u32 1, %s1118_s8  }
   0xe   : > { %p1189_p10 = por %p61_p7, %p31_p0  ;;  %p1193_p11 = por %p67_p8, %p37_p3 }
   0xf   : > { %s846_s21 = sshll.u32 %s1122_s9, 12  ;;  %s803_s22 = sshll.u32 %s87_s20, 8 }
  0x10   : > { %s1809_s18 = scalar_select %p1189_p10, 1, 0 }
  0x11   : > { %s1810_s19 = scalar_select %p1193_p11, 1, 0 }
  0x12   : > { %s1202_s25 = scalar_lea.hbm %s1804_s0, %s846_s21  ;;  %s91_s26 = scalar_lea.vmem [#allocation2], %s803_s22 }
  0x13   : > { %s98_s27 = sshll.u32 %s91_s26, 4  ;;  %p1206_p12 = pnand %p860_p9, %p1179_p5  ;;  %s1210_s27 = int_to_ptr.vmem [resolvable:$true] %s98_s27 }
  0x14   : > { %s1212_s29 = scalar_lea.sflag [#allocation3], %s87_s20  ;;  %s1026_s30 = scalar_lea.hbm %s1202_s25, 4096 }
  0x15   : > { %p1027_p13 = scmp.ne.s32.totalorder %s1202_s25, %s1026_s30  ;;  %p1028_p0 = pneg %p1206_p12 }
  0x16   : > { %s1031_s4 = scalar_lea.hbm %s1804_s0, 16384  ;;  %p1032_p3 = scmp.lt.u32.totalorder %s1202_s25, %s1804_s0 }
  0x17   : > { %p1029_p1 = pnand %p1028_p0, %p1027_p13  ;;  %p1033_p4 = scmp.lt.u32.totalorder %s1031_s4, %s1026_s30 }
  0x18   : > { %p1035_p7 = scmp.lt.u32.totalorder %s1026_s30, %s1202_s25 }
  0x19   : > { %p1030_p2 = pneg %p1029_p1  ;;  %p1034_p5 = por %p1033_p4, %p1032_p3 }
  0x1b   : > { %p1036_p8 = por %p1035_p7, %p1034_p5 }
  0x1d   : > { %p1037_p9 = pnand %p1036_p8, %p1030_p2 }
  0x1f   : > { %1040 = shalt.err (!%p1037_p9)
}
  0x20   : > { %s1041_s13 = scalar_lea.vmem %s1210_s27, 4096  ;;  %s1124_s14 = smov [#allocation2]  }
  0x21   : > { %p1042_p13 = scmp.ne.s32.totalorder %s1210_s27, %s1041_s13  ;;  %s1046_s16 = sshll.u32 %s1124_s14, 4  ;;  %s1047_s16 = int_to_ptr.vmem [resolvable:$false] %s1046_s16 }
  0x22   : > { %s1048_s20 = scalar_lea.vmem %s1047_s16, 8192  ;;  %p1049_p10 = scmp.lt.s32.totalorder %s1210_s27, %s1047_s16 }
  0x23   : > { %p1044_p1 = pnand %p1042_p13, %p1028_p0  ;;  %p1050_p3 = scmp.lt.s32.totalorder %s1048_s20, %s1041_s13 }
  0x25   : > { %p1045_p11 = pneg %p1044_p1  ;;  %p1051_p4 = por %p1050_p3, %p1049_p10 }
  0x27   : > { %p1052_p5 = pnand %p1051_p4, %p1045_p11 }
  0x29   : > { %1055 = shalt.err (!%p1052_p5)
}
  0x2a   : > { %s1125_s21 = smov 128   ;;  %s1126_s22 = smov 8  }
  0x2b   : > { %855 = dma.hbm_to_vmem [thread:$0]  (!%p1206_p12), %s1202_s25, 4096, %s1210_s27, %s1212_s29, %s1125_s21, %s1125_s21, %s1126_s22  }
  0x2c   : > { %p806_p0 = scmp.ge.s32.totalorder %s1122_s9, 1  ;;  %p106_p2 = scmp.lt.s32.totalorder %s1122_s9, 5 }
  0x2e   : > { %p107_p7 = pnand %p806_p0, %p106_p2 }
  0x2f   : > { %s1243_s23 = sand.u32 (!%p107_p7), 1, %s1114_s7  }
  0x30   : > { %110 = sbr.rel (%p107_p7) target bundleno = 211 (0xd3), region = 24  ;;  %s807_s24 = sshll.u32 (!%p107_p7), %s1243_s23, 8 }
  0x31   : > { %s113_s26 = scalar_lea.sflag (!%p107_p7), [#allocation3], %s1243_s23  ;;  %s1249_s30 = scalar_lea.vmem (!%p107_p7), [#allocation2], %s807_s24 }
  0x37   : > { %1101 = dma.done.wait (%p1183_p6), %s113_s26, 4096  }
  0x38   : > { %1103 = vsyncadd (%p1183_p6), %s113_s26, 4294963200  ;;  %v1256_v0 = vld [vmem:[%s1249_s30] sm:$0xff]  ;;  %v1259_v1 = vld [vmem:[%s1249_s30 + $0x8] sm:$0xff]  ;;  %s1387_s17 = scalar_lea.vmem [#allocation5], %s807_s24  ;;  %s847_s25 = sshll.u32 %s1161_s10, 12 }
  0x39   : > { %v1262_v2 = vld [vmem:[%s1249_s30 + $0x10] sm:$0xff]  ;;  %v201_v3 = vand.u32 2147483647, %v1256_v0  ;;  %v202_v4 = vand.u32 2147483647, %v1259_v1  ;;  %v1268_v6 = vld [vmem:[%s1249_s30 + $0x18] sm:$0xff]  ;;  %s1758_s2 = scalar_lea.hbm %s1805_s1, %s847_s25 }
  0x3a   : > { %v203_v5 = vand.u32 2147483647, %v1262_v2  ;;  %v1271_v7 = vld [vmem:[%s1249_s30 + $0x20] sm:$0xff]  ;;  %v204_v10 = vand.u32 2147483647, %v1268_v6  ;;  %v1275_v11 = vld [vmem:[%s1249_s30 + $0x28] sm:$0xff] }
  0x3b   : > { %v233_v8 = vsub.f32 0.0, %v201_v3  ;;  %v234_v9 = vsub.f32 0.0, %v202_v4  ;;  %v205_v13 = vand.u32 2147483647, %v1271_v7  ;;  %v1279_v14 = vld [vmem:[%s1249_s30 + $0x30] sm:$0xff]  ;;  %v1282_v15 = vld [vmem:[%s1249_s30 + $0x38] sm:$0xff] }
  0x3c   : > { %v235_v12 = vsub.f32 0.0, %v203_v5  ;;  %v236_v18 = vsub.f32 0.0, %v204_v10  ;;  %v206_v21 = vand.u32 2147483647, %v1275_v11  ;;  %v207_v23 = vand.u32 2147483647, %v1279_v14 }
  0x3d   : > { %v265_v16 = vmul.f32 1.442695, %v233_v8  ;;  %v267_v17 = vmul.f32 1.442695, %v234_v9  ;;  %v237_v20 = vsub.f32 0.0, %v205_v13  ;;  %v169_v25 = vmax.f32 %v1256_v0, 0.0 }
  0x3e   : > { %v269_v19 = vmul.f32 1.442695, %v235_v12  ;;  %v271_v22 = vmul.f32 1.442695, %v236_v18  ;;  %v208_v24 = vand.u32 2147483647, %v1282_v15 }
  0x3f   : > { %898 = vpow2.f32 %v265_v16  ;;  %v273_v26 = vmul.f32 1.442695, %v237_v20  ;;  %v238_v27 = vsub.f32 0.0, %v206_v21  ;;  %v1289_v28 = vld [vmem:[%s1249_s30 + $0x40] sm:$0xff]  ;;  %v1292_v29 = vld [vmem:[%s1249_s30 + $0x48] sm:$0xff]  ;;  %v170_v30 = vmax.f32 %v1259_v1, 0.0 }
  0x40   : > { %900 = vpow2.f32 %v267_v17  ;;  %v239_v31 = vsub.f32 0.0, %v207_v23  ;;  %v240_v32 = vsub.f32 0.0, %v208_v24  ;;  %v1296_v33 = vld [vmem:[%s1249_s30 + $0x50] sm:$0xff]  ;;  %v171_v34 = vmax.f32 %v1262_v2, 0.0  ;;  %v1301_v37 = vld [vmem:[%s1249_s30 + $0x58] sm:$0xff]  ;;  %v1310_v48 = vld [vmem:[%s1249_s30 + $0x60] sm:$0xff] }
  0x41   : > { %902 = vpow2.f32 %v269_v19  ;;  %v275_v35 = vmul.f32 1.442695, %v238_v27  ;;  %v209_v36 = vand.u32 2147483647, %v1289_v28  ;;  %v210_v40 = vand.u32 2147483647, %v1292_v29 }
  0x42   : > { %904 = vpow2.f32 %v271_v22  ;;  %v277_v38 = vmul.f32 1.442695, %v239_v31  ;;  %v279_v39 = vmul.f32 1.442695, %v240_v32  ;;  %v172_v41 = vmax.f32 %v1268_v6, 0.0  ;;  %v1317_v58 = vld [vmem:[%s1249_s30 + $0x68] sm:$0xff] }
  0x43   : > { %906 = vpow2.f32 %v273_v26  ;;  %v173_v42 = vmax.f32 %v1271_v7, 0.0  ;;  %v241_v43 = vsub.f32 0.0, %v209_v36  ;;  %v211_v44 = vand.u32 2147483647, %v1296_v33  ;;  %v1323_v13 = vld [vmem:[%s1249_s30 + $0x70] sm:$0xff]  ;;  %s727_s27 = sshll.u32 %s1387_s17, 4  ;;  %s1760_s27 = int_to_ptr.vmem [resolvable:$true] %s727_s27 }
  0x44   : > { %v174_v45 = vmax.f32 %v1275_v11, 0.0  ;;  %908 = vpow2.f32 %v275_v35  ;;  %v242_v46 = vsub.f32 0.0, %v210_v40  ;;  %v212_v47 = vand.u32 2147483647, %v1301_v37  ;;  %s714_s3 = scalar_lea.sflag [#allocation4], %s1243_s23  ;;  %s1056_s4 = scalar_lea.vmem %s1760_s27, 4096 }
  0x45   : > { %v175_v49 = vmax.f32 %v1279_v14, 0.0  ;;  %910 = vpow2.f32 %v277_v38  ;;  %v281_v50 = vmul.f32 1.442695, %v241_v43  ;;  %v243_v51 = vsub.f32 0.0, %v211_v44  ;;  %p1057_p6 = scmp.ne.s32.totalorder %s1760_s27, %s1056_s4  ;;  %p1874_p10 = scmp.ne.s32.totalorder %s1809_s18, 0 }
  0x46   : > { %v176_v52 = vmax.f32 %v1282_v15, 0.0  ;;  %912 = vpow2.f32 %v279_v39  ;;  %v283_v53 = vmul.f32 1.442695, %v242_v46  ;;  %v244_v54 = vsub.f32 0.0, %v212_v47  ;;  %s1127_s10 = smov [#allocation5]  }
  0x47   : > { %v177_v55 = vmax.f32 %v1289_v28, 0.0  ;;  %914 = vpow2.f32 %v281_v50  ;;  %v285_v56 = vmul.f32 1.442695, %v243_v51  ;;  %v213_v57 = vand.u32 2147483647, %v1310_v48  ;;  %p1058_p11 = pnand %p1057_p6, %p1874_p10  ;;  %s1060_s5 = sshll.u32 %s1127_s10, 4  ;;  %s1061_s5 = int_to_ptr.vmem [resolvable:$false] %s1060_s5 }
  0x48   : > { %916 = vpow2.f32 %v283_v53  ;;  %v287_v62 = vmul.f32 1.442695, %v244_v54  ;;  %v214_v12 = vand.u32 2147483647, %v1317_v58  ;;  %v215_v27 = vand.u32 2147483647, %v1323_v13  ;;  %p1063_p8 = scmp.lt.s32.totalorder %s1760_s27, %s1061_s5 }
  0x49   : > { %v899_v59 = vpop.eup %898  ;;  %918 = vpow2.f32 %v285_v56  ;;  %v1325_v19 = vsub.f32 0.0, %v213_v57  ;;  %p1059_p12 = pneg %p1058_p11  ;;  %s1062_s11 = scalar_lea.vmem %s1061_s5, 8192 }
  0x4a   : > { %v901_v63 = vpop.eup %900  ;;  %v329_v3 = vadd.f32 1.0, %v899_v59  ;;  %v332_v4 = vmul.f32 -0.5, %v899_v59  ;;  %v335_v5 = vand.u32 2147483647, %v899_v59  ;;  %920 = vpow2.f32 %v287_v62  ;;  %p1064_p9 = scmp.lt.s32.totalorder %s1062_s11, %s1056_s4 }
  0x4b   : > { %v903_v8 = vpop.eup %902  ;;  %v338_v9 = vadd.f32 1.0, %v901_v63  ;;  %v341_v10 = vmul.f32 -0.5, %v901_v63  ;;  %v344_v17 = vand.u32 2147483647, %v901_v63  ;;  %v247_v28 = vsub.f32 0.0, %v215_v27 }
  0x4c   : > { %v905_v16 = vpop.eup %904  ;;  %922 = vlog2.f32 %v329_v3  ;;  %v347_v18 = vadd.f32 1.0, %v903_v8  ;;  %v333_v21 = vadd.f32 1.0, %v332_v4  ;;  %v350_v23 = vmul.f32 -0.5, %v903_v8  ;;  %p1065_p13 = por %p1064_p9, %p1063_p8 }
  0x4d   : > { %v907_v20 = vpop.eup %906  ;;  %924 = vlog2.f32 %v338_v9  ;;  %v342_v22 = vadd.f32 1.0, %v341_v10  ;;  %vm1327_vm0 = vcmp.lt.f32.partialorder %v335_v5, 0.0004427343  ;;  %v356_v26 = vadd.f32 1.0, %v905_v16 }
  0x4e   : > { %926 = vlog2.f32 %v347_v18  ;;  %v909_v31 = vpop.eup %908  ;;  %v351_v32 = vadd.f32 1.0, %v350_v23  ;;  %v353_v35 = vand.u32 2147483647, %v903_v8  ;;  %v359_v36 = vmul.f32 -0.5, %v905_v16  ;;  %p1066_p1 = pnand %p1065_p13, %p1059_p12 }
  0x4f   : > { %v362_v38 = vand.u32 2147483647, %v905_v16  ;;  %v911_v39 = vpop.eup %910  ;;  %vm1332_vm1 = vcmp.lt.f32.partialorder %v344_v17, 0.0004427343  ;;  %928 = vlog2.f32 %v356_v26  ;;  %v365_v43 = vadd.f32 1.0, %v907_v20 }
  0x50   : > { %v368_v44 = vmul.f32 -0.5, %v907_v20  ;;  %v913_v46 = vpop.eup %912  ;;  %v334_v47 = vmul.f32 %v899_v59, %v333_v21  ;;  %v343_v50 = vmul.f32 %v901_v63, %v342_v22  ;;  %v360_v51 = vadd.f32 1.0, %v359_v36 }
  0x51   : > { %v371_v53 = vand.u32 2147483647, %v907_v20  ;;  %v1336_v54 = vpop.eup %914  ;;  %930 = vlog2.f32 %v365_v43  ;;  %v374_v57 = vadd.f32 1.0, %v909_v31  ;;  %v377_v62 = vmul.f32 -0.5, %v909_v31 }
  0x52   : > { %v369_v56 = vadd.f32 1.0, %v368_v44  ;;  %v1338_v3 = vpop.eup %916  ;;  %v352_v4 = vmul.f32 %v903_v8, %v351_v32  ;;  %vm1340_vm2 = vcmp.lt.f32.partialorder %v353_v35, 0.0004427343  ;;  %vm1344_vm3 = vcmp.lt.f32.partialorder %v362_v38, 0.0004427343 }
  0x53   : > { %v383_v59 = vadd.f32 1.0, %v911_v39  ;;  %v1348_v63 = vpop.eup %918  ;;  %932 = vlog2.f32 %v374_v57  ;;  %v378_v10 = vadd.f32 1.0, %v377_v62  ;;  %v380_v17 = vand.u32 2147483647, %v909_v31 }
  0x54   : > { %v386_v18 = vmul.f32 -0.5, %v911_v39  ;;  %v1350_v21 = vpop.eup %920  ;;  %v361_v22 = vmul.f32 %v905_v16, %v360_v51  ;;  %vm1352_vm4 = vcmp.lt.f32.partialorder %v371_v53, 0.0004427343  ;;  %v392_v23 = vadd.f32 1.0, %v913_v46 }
  0x55   : > { %934 = vlog2.f32 %v383_v59  ;;  %v370_v32 = vmul.f32 %v907_v20, %v369_v56  ;;  %v389_v36 = vand.u32 2147483647, %v911_v39  ;;  %v395_v38 = vmul.f32 -0.5, %v913_v46 }
  0x56   : > { %v923_v26 = vpop.eup %922  ;;  %v387_v35 = vadd.f32 1.0, %v386_v18  ;;  %936 = vlog2.f32 %v392_v23  ;;  %v398_v57 = vand.u32 2147483647, %v913_v46  ;;  %v401_v62 = vadd.f32 1.0, %v1336_v54 }
  0x57   : > { %v925_v43 = vpop.eup %924  ;;  %v331_v44 = vmul.f32 0.6931472, %v923_v26  ;;  %v379_v16 = vmul.f32 %v909_v31, %v378_v10  ;;  %vm1357_vm5 = vcmp.lt.f32.partialorder %v380_v17, 0.0004427343  ;;  %v396_v53 = vadd.f32 1.0, %v395_v38 }
  0x58   : > { %v927_v61 = vpop.eup %926  ;;  %v340_v60 = vmul.f32 0.6931472, %v925_v43  ;;  %938 = vlog2.f32 %v401_v62  ;;  %v404_v59 = vmul.f32 -0.5, %v1336_v54  ;;  %v388_v31 = vmul.f32 %v911_v39, %v387_v35 }
  0x59   : > { %v337_v20 = vsel %vm1327_vm0, %v334_v47, %v331_v44  ;;  %v349_v56 = vmul.f32 0.6931472, %v927_v61  ;;  %v929_v18 = vpop.eup %928  ;;  %vm1368_vm6 = vcmp.lt.f32.partialorder %v389_v36, 0.0004427343  ;;  %vm1376_vm7 = vcmp.lt.f32.partialorder %v398_v57, 0.0004427343 }
  0x5a   : > { %v617_v23 = vadd.f32 %v337_v20, %v169_v25  ;;  %v346_v26 = vsel %vm1332_vm1, %v343_v50, %v340_v60  ;;  %v358_v47 = vmul.f32 0.6931472, %v929_v18  ;;  %v405_v39 = vadd.f32 1.0, %v404_v59 }
  0x5b   : > { %v618_v24 = vadd.f32 %v346_v26, %v170_v30  ;;  %v355_v61 = vsel %vm1340_vm2, %v352_v4, %v349_v56  ;;  %v931_v0 = vpop.eup %930  ;;  %v410_v40 = vadd.f32 1.0, %v1338_v3  ;;  %v397_v5 = vmul.f32 %v913_v46, %v396_v53 }
  0x5c   : > { %v809_v25 = vadd.f32 -0.6931472, %v617_v23  ;;  %v619_v60 = vadd.f32 %v355_v61, %v171_v34  ;;  %v364_v1 = vsel %vm1344_vm3, %v361_v22, %v358_v47  ;;  %v367_v30 = vmul.f32 0.6931472, %v931_v0  ;;  %v1431_v47 = vld [vmem:[%s1249_s30 + $0x78] sm:$0xff]  ;;  %v1440_v0 = vld [vmem:[%s1249_s30 + $0x80] sm:$0xff] }
  0x5d   : > { %v810_v50 = vadd.f32 -0.6931472, %v618_v24  ;;  %v933_v4 = vpop.eup %932  ;;  %v620_v2 = vadd.f32 %v364_v1, %v172_v41  ;;  %940 = vlog2.f32 %v410_v40  ;;  %v413_v34 = vmul.f32 -0.5, %v1338_v3 }
  0x5e   : > { %681 = vst [vmem:[%s1387_s17] sm:$0xff] %v809_v25  ;;  %v811_v35 = vadd.f32 -0.6931472, %v619_v60  ;;  %v373_v46 = vsel %vm1352_vm4, %v370_v32, %v367_v30  ;;  %v376_v9 = vmul.f32 0.6931472, %v933_v4  ;;  %v407_v22 = vand.u32 2147483647, %v1336_v54 }
  0x5f   : > { %v935_v36 = vpop.eup %934  ;;  %682 = vst [vmem:[%s1387_s17 + $0x8] sm:$0xff] %v810_v50  ;;  %v419_v38 = vadd.f32 1.0, %v1348_v63  ;;  %v812_v43 = vadd.f32 -0.6931472, %v620_v2  ;;  %v621_v6 = vadd.f32 %v373_v46, %v173_v42  ;;  %v406_v44 = vmul.f32 %v1336_v54, %v405_v39  ;;  %v1459_v4 = vld [vmem:[%s1249_s30 + $0x90] sm:$0xff] }
  0x60   : > { %683 = vst [vmem:[%s1387_s17 + $0x10] sm:$0xff] %v811_v35  ;;  %v385_v41 = vmul.f32 0.6931472, %v935_v36  ;;  %v937_v57 = vpop.eup %936  ;;  %v382_v62 = vsel %vm1357_vm5, %v379_v16, %v376_v9  ;;  %v414_v8 = vadd.f32 1.0, %v413_v34  ;;  %v422_v32 = vmul.f32 -0.5, %v1348_v63 }
  0x61   : > { %942 = vlog2.f32 %v419_v38  ;;  %684 = vst [vmem:[%s1387_s17 + $0x18] sm:$0xff] %v812_v43  ;;  %v813_v53 = vadd.f32 -0.6931472, %v621_v6  ;;  %v622_v20 = vadd.f32 %v382_v62, %v174_v45  ;;  %v394_v42 = vmul.f32 0.6931472, %v937_v57  ;;  %v1471_v6 = vld [vmem:[%s1249_s30 + $0x98] sm:$0xff] }
  0x62   : > { %v391_v7 = vsel %vm1368_vm6, %v388_v31, %v385_v41  ;;  %v939_v54 = vpop.eup %938  ;;  %vm1412_vm8 = vcmp.lt.f32.partialorder %v407_v22, 0.0004427343  ;;  %v416_v51 = vand.u32 2147483647, %v1338_v3  ;;  %v425_v59 = vand.u32 2147483647, %v1348_v63 }
  0x63   : > { %v623_v56 = vadd.f32 %v391_v7, %v175_v49  ;;  %685 = vst [vmem:[%s1387_s17 + $0x20] sm:$0xff] %v813_v53  ;;  %v814_v11 = vadd.f32 -0.6931472, %v622_v20  ;;  %v400_v45 = vsel %vm1376_vm7, %v397_v5, %v394_v42  ;;  %v403_v18 = vmul.f32 0.6931472, %v939_v54  ;;  %v1479_v7 = vld [vmem:[%s1249_s30 + $0xa0] sm:$0xff] }
  0x64   : > { %v428_v23 = vadd.f32 1.0, %v1350_v21  ;;  %v624_v49 = vadd.f32 %v400_v45, %v176_v52  ;;  %v415_v26 = vmul.f32 %v1338_v3, %v414_v8  ;;  %v180_v31 = vmax.f32 %v1301_v37, 0.0 }
  0x65   : > { %v815_v14 = vadd.f32 -0.6931472, %v623_v56  ;;  %686 = vst [vmem:[%s1387_s17 + $0x28] sm:$0xff] %v814_v11  ;;  %v409_v10 = vsel %vm1412_vm8, %v406_v44, %v403_v18  ;;  %v423_v24 = vadd.f32 1.0, %v422_v32  ;;  %v431_v61 = vmul.f32 -0.5, %v1350_v21  ;;  %v1490_v18 = vld [vmem:[%s1249_s30 + $0xa8] sm:$0xff] }
  0x66   : > { %944 = vlog2.f32 %v428_v23  ;;  %v816_v17 = vadd.f32 -0.6931472, %v624_v49  ;;  %v625_v15 = vadd.f32 %v409_v10, %v177_v55  ;;  %v289_v52 = vmul.f32 1.442695, %v1325_v19  ;;  %v1453_v55 = vld [vmem:[%s1249_s30 + $0x88] sm:$0xff] }
  0x67   : > { %687 = vst [vmem:[%s1387_s17 + $0x30] sm:$0xff] %v815_v14  ;;  %v246_v3 = vsub.f32 0.0, %v214_v12  ;;  %v941_v25 = vpop.eup %940  ;;  %vm1442_vm9 = vcmp.lt.f32.partialorder %v416_v51, 0.0004427343  ;;  %vm1446_vm10 = vcmp.lt.f32.partialorder %v425_v59, 0.0004427343  ;;  %v424_v50 = vmul.f32 %v1348_v63, %v423_v24 }
  0x68   : > { %688 = vst [vmem:[%s1387_s17 + $0x38] sm:$0xff] %v816_v17  ;;  %v817_v12 = vadd.f32 -0.6931472, %v625_v15  ;;  %v412_v19 = vmul.f32 0.6931472, %v941_v25  ;;  %946 = vpow2.f32 %v289_v52  ;;  %v432_v1 = vadd.f32 1.0, %v431_v61 }
  0x69   : > { %v291_v40 = vmul.f32 1.442695, %v246_v3  ;;  %v293_v30 = vmul.f32 1.442695, %v247_v28  ;;  %v216_v5 = vand.u32 2147483647, %v1431_v47 }
  0x6a   : > { %689 = vst [vmem:[%s1387_s17 + $0x40] sm:$0xff] %v817_v12  ;;  %v418_v27 = vsel %vm1442_vm9, %v415_v26, %v412_v19  ;;  %v434_v2 = vand.u32 2147483647, %v1350_v21  ;;  %v217_v34 = vand.u32 2147483647, %v1440_v0  ;;  %v1834_v36 = vmax.f32 %v1292_v29, 0.0 }
  0x6b   : > { %v943_v35 = vpop.eup %942  ;;  %948 = vpow2.f32 %v291_v40  ;;  %v248_v9 = vsub.f32 0.0, %v216_v5  ;;  %v218_v38 = vand.u32 2147483647, %v1453_v55  ;;  %v219_v43 = vand.u32 2147483647, %v1459_v4 }
  0x6c   : > { %v626_v63 = vadd.f32 %v418_v27, %v1834_v36  ;;  %v421_v46 = vmul.f32 0.6931472, %v943_v35  ;;  %950 = vpow2.f32 %v293_v30  ;;  %v249_v22 = vsub.f32 0.0, %v217_v34 }
  0x6d   : > { %v433_v57 = vmul.f32 %v1350_v21, %v432_v1  ;;  %v295_v29 = vmul.f32 1.442695, %v248_v9  ;;  %v1835_v62 = vmax.f32 %v1296_v33, 0.0  ;;  %v250_v53 = vsub.f32 0.0, %v218_v38 }
  0x6e   : > { %v818_v41 = vadd.f32 -0.6931472, %v626_v63  ;;  %v427_v44 = vsel %vm1446_vm10, %v424_v50, %v421_v46  ;;  %v297_v32 = vmul.f32 1.442695, %v249_v22  ;;  %v251_v20 = vsub.f32 0.0, %v219_v43  ;;  %v1504_v50 = vld [vmem:[%s1249_s30 + $0xb0] sm:$0xff] }
  0x6f   : > { %v627_v8 = vadd.f32 %v427_v44, %v1835_v62  ;;  %vm1482_vm11 = vcmp.lt.f32.partialorder %v434_v2, 0.0004427343  ;;  %v181_v56 = vmax.f32 %v1310_v48, 0.0  ;;  %952 = vpow2.f32 %v295_v29 }
  0x70   : > { %v945_v42 = vpop.eup %944  ;;  %690 = vst [vmem:[%s1387_s17 + $0x48] sm:$0xff] %v818_v41  ;;  %v220_v21 = vand.u32 2147483647, %v1471_v6  ;;  %954 = vpow2.f32 %v297_v32  ;;  %v299_v51 = vmul.f32 1.442695, %v250_v53  ;;  %v182_v49 = vmax.f32 %v1317_v58, 0.0 }
  0x71   : > { %v819_v33 = vadd.f32 -0.6931472, %v627_v8  ;;  %v430_v16 = vmul.f32 0.6931472, %v945_v42  ;;  %v301_v59 = vmul.f32 1.442695, %v251_v20 }
  0x72   : > { %v252_v11 = vsub.f32 0.0, %v220_v21  ;;  %v221_v45 = vand.u32 2147483647, %v1479_v7  ;;  %v947_v23 = vpop.eup %946  ;;  %v183_v26 = vmax.f32 %v1323_v13, 0.0  ;;  %956 = vpow2.f32 %v299_v51  ;;  %v1556_v58 = vld [vmem:[%s1249_s30 + $0xb8] sm:$0xff] }
  0x73   : > { %691 = vst [vmem:[%s1387_s17 + $0x50] sm:$0xff] %v819_v33  ;;  %v436_v14 = vsel %vm1482_vm11, %v433_v57, %v430_v16  ;;  %v437_v24 = vadd.f32 1.0, %v947_v23  ;;  %v440_v61 = vmul.f32 -0.5, %v947_v23  ;;  %v184_v17 = vmax.f32 %v1431_v47, 0.0 }
  0x74   : > { %v628_v10 = vadd.f32 %v436_v14, %v180_v31  ;;  %v185_v52 = vmax.f32 %v1440_v0, 0.0  ;;  %958 = vpow2.f32 %v301_v59  ;;  %v303_v3 = vmul.f32 1.442695, %v252_v11 }
  0x75   : > { %v949_v15 = vpop.eup %948  ;;  %v222_v25 = vand.u32 2147483647, %v1490_v18  ;;  %960 = vlog2.f32 %v437_v24  ;;  %v443_v28 = vand.u32 2147483647, %v947_v23  ;;  %v253_v12 = vsub.f32 0.0, %v221_v45 }
  0x76   : > { %v951_v60 = vpop.eup %950  ;;  %v820_v39 = vadd.f32 -0.6931472, %v628_v10  ;;  %v446_v37 = vadd.f32 1.0, %v949_v15  ;;  %v449_v31 = vmul.f32 -0.5, %v949_v15  ;;  %v186_v40 = vmax.f32 %v1453_v55, 0.0 }
  0x77   : > { %v455_v19 = vadd.f32 1.0, %v951_v60  ;;  %v441_v1 = vadd.f32 1.0, %v440_v61  ;;  %v452_v30 = vand.u32 2147483647, %v949_v15  ;;  %v458_v5 = vmul.f32 -0.5, %v951_v60 }
  0x78   : > { %692 = vst [vmem:[%s1387_s17 + $0x58] sm:$0xff] %v820_v39  ;;  %962 = vpow2.f32 %v303_v3  ;;  %v187_v35 = vmax.f32 %v1459_v4, 0.0  ;;  %v188_v27 = vmax.f32 %v1471_v6, 0.0  ;;  %v254_v2 = vsub.f32 0.0, %v222_v25 }
  0x79   : > { %964 = vlog2.f32 %v446_v37  ;;  %v953_v34 = vpop.eup %952  ;;  %vm1509_vm12 = vcmp.lt.f32.partialorder %v443_v28, 0.0004427343  ;;  %v305_v63 = vmul.f32 1.442695, %v253_v12  ;;  %v223_v46 = vand.u32 2147483647, %v1504_v50 }
  0x7a   : > { %966 = vlog2.f32 %v455_v19  ;;  %v955_v9 = vpop.eup %954  ;;  %v450_v22 = vadd.f32 1.0, %v449_v31  ;;  %v459_v38 = vadd.f32 1.0, %v458_v5  ;;  %v461_v43 = vand.u32 2147483647, %v951_v60 }
  0x7b   : > { %v464_v41 = vadd.f32 1.0, %v953_v34  ;;  %v442_v44 = vmul.f32 %v947_v23, %v441_v1  ;;  %vm1514_vm13 = vcmp.lt.f32.partialorder %v452_v30, 0.0004427343  ;;  %v467_v29 = vmul.f32 -0.5, %v953_v34 }
  0x7c   : > { %v473_v62 = vadd.f32 1.0, %v955_v9  ;;  %v957_v8 = vpop.eup %956  ;;  %v470_v32 = vand.u32 2147483647, %v953_v34  ;;  %v476_v53 = vmul.f32 -0.5, %v955_v9  ;;  %v307_v20 = vmul.f32 1.442695, %v254_v2 }
  0x7d   : > { %968 = vlog2.f32 %v464_v41  ;;  %v479_v42 = vand.u32 2147483647, %v955_v9  ;;  %v482_v54 = vadd.f32 1.0, %v957_v8  ;;  %v255_v21 = vsub.f32 0.0, %v223_v46 }
  0x7e   : > { %970 = vlog2.f32 %v473_v62  ;;  %v959_v33 = vpop.eup %958  ;;  %v451_v16 = vmul.f32 %v949_v15, %v450_v22  ;;  %v460_v51 = vmul.f32 %v951_v60, %v459_v38  ;;  %vm1518_vm14 = vcmp.lt.f32.partialorder %v461_v43, 0.0004427343 }
  0x7f   : > { %972 = vpow2.f32 %v305_v63  ;;  %v961_v11 = vpop.eup %960  ;;  %v468_v45 = vadd.f32 1.0, %v467_v29  ;;  %v485_v23 = vmul.f32 -0.5, %v957_v8  ;;  %v491_v14 = vadd.f32 1.0, %v959_v33 }
  0x80   : > { %974 = vlog2.f32 %v482_v54  ;;  %v439_v10 = vmul.f32 0.6931472, %v961_v11  ;;  %vm1522_vm15 = vcmp.lt.f32.partialorder %v470_v32, 0.0004427343  ;;  %v494_v61 = vmul.f32 -0.5, %v959_v33 }
  0x81   : > { %976 = vpow2.f32 %v307_v20  ;;  %v477_v15 = vadd.f32 1.0, %v476_v53  ;;  %vm1528_vm0 = vcmp.lt.f32.partialorder %v479_v42, 0.0004427343  ;;  %v309_v60 = vmul.f32 1.442695, %v255_v21 }
  0x82   : > { %v1526_v3 = vpop.eup %962  ;;  %978 = vlog2.f32 %v491_v14  ;;  %v445_v28 = vsel %vm1509_vm12, %v442_v44, %v439_v10  ;;  %v488_v12 = vand.u32 2147483647, %v957_v8  ;;  %v486_v5 = vadd.f32 1.0, %v485_v23 }
  0x83   : > { %v965_v39 = vpop.eup %964  ;;  %v500_v37 = vadd.f32 1.0, %v1526_v3  ;;  %v503_v31 = vmul.f32 -0.5, %v1526_v3  ;;  %v629_v1 = vadd.f32 %v445_v28, %v181_v56  ;;  %v497_v2 = vand.u32 2147483647, %v959_v33 }
  0x84   : > { %v967_v19 = vpop.eup %966  ;;  %v448_v30 = vmul.f32 0.6931472, %v965_v39  ;;  %v469_v46 = vmul.f32 %v953_v34, %v468_v45  ;;  %v495_v22 = vadd.f32 1.0, %v494_v61  ;;  %v478_v44 = vmul.f32 %v955_v9, %v477_v15 }
  0x85   : > { %v457_v63 = vmul.f32 0.6931472, %v967_v19  ;;  %980 = vlog2.f32 %v500_v37  ;;  %v821_v36 = vadd.f32 -0.6931472, %v629_v1  ;;  %v504_v43 = vadd.f32 1.0, %v503_v31 }
  0x86   : > { %v454_v38 = vsel %vm1514_vm13, %v451_v16, %v448_v30  ;;  %982 = vpow2.f32 %v309_v60  ;;  %vm1544_vm1 = vcmp.lt.f32.partialorder %v488_v12, 0.0004427343  ;;  %v487_v32 = vmul.f32 %v957_v8, %v486_v5 }
  0x87   : > { %v969_v41 = vpop.eup %968  ;;  %v630_v48 = vadd.f32 %v454_v38, %v182_v49  ;;  %v463_v56 = vsel %vm1518_vm14, %v460_v51, %v457_v63  ;;  %693 = vst [vmem:[%s1387_s17 + $0x60] sm:$0xff] %v821_v36  ;;  %vm1551_vm2 = vcmp.lt.f32.partialorder %v497_v2, 0.0004427343  ;;  %v1559_v49 = vld [vmem:[%s1249_s30 + $0xc0] sm:$0xff]  ;;  %v496_v54 = vmul.f32 %v959_v33, %v495_v22  ;;  %v1602_v36 = vld [vmem:[%s1249_s30 + $0xc8] sm:$0xff] }
  0x88   : > { %v971_v29 = vpop.eup %970  ;;  %v631_v57 = vadd.f32 %v463_v56, %v183_v26  ;;  %v466_v62 = vmul.f32 0.6931472, %v969_v41  ;;  %v506_v13 = vand.u32 2147483647, %v1526_v3  ;;  %v505_v16 = vmul.f32 %v1526_v3, %v504_v43  ;;  %v1609_v41 = vld [vmem:[%s1249_s30 + $0xd0] sm:$0xff]  ;;  %v1615_v56 = vld [vmem:[%s1249_s30 + $0xe0] sm:$0xff] }
  0x89   : > { %v1561_v9 = vpop.eup %972  ;;  %v822_v20 = vadd.f32 -0.6931472, %v630_v48  ;;  %v475_v42 = vmul.f32 0.6931472, %v971_v29  ;;  %v224_v23 = vand.u32 2147483647, %v1556_v58 }
  0x8a   : > { %v975_v26 = vpop.eup %974  ;;  %v823_v21 = vadd.f32 -0.6931472, %v631_v57  ;;  %v472_v8 = vsel %vm1522_vm15, %v469_v46, %v466_v62  ;;  %v509_v51 = vadd.f32 1.0, %v1561_v9  ;;  %v225_v61 = vand.u32 2147483647, %v1559_v49  ;;  %v1612_v48 = vld [vmem:[%s1249_s30 + $0xd8] sm:$0xff] }
  0x8b   : > { %v977_v59 = vpop.eup %976  ;;  %694 = vst [vmem:[%s1387_s17 + $0x68] sm:$0xff] %v822_v20  ;;  %v632_v11 = vadd.f32 %v472_v8, %v184_v17  ;;  %v481_v45 = vsel %vm1528_vm0, %v478_v44, %v475_v42  ;;  %v484_v33 = vmul.f32 0.6931472, %v975_v26  ;;  %v512_v15 = vmul.f32 -0.5, %v1561_v9 }
  0x8c   : > { %v979_v14 = vpop.eup %978  ;;  %695 = vst [vmem:[%s1387_s17 + $0x70] sm:$0xff] %v823_v21  ;;  %v633_v10 = vadd.f32 %v481_v45, %v185_v52  ;;  %984 = vlog2.f32 %v509_v51  ;;  %v518_v24 = vadd.f32 1.0, %v977_v59  ;;  %vm1583_vm3 = vcmp.lt.f32.partialorder %v506_v13, 0.0004427343 }
  0x8d   : > { %v824_v3 = vadd.f32 -0.6931472, %v632_v11  ;;  %v490_v47 = vsel %vm1544_vm1, %v487_v32, %v484_v33  ;;  %v493_v17 = vmul.f32 0.6931472, %v979_v14  ;;  %v515_v28 = vand.u32 2147483647, %v1561_v9 }
  0x8e   : > { %v825_v25 = vadd.f32 -0.6931472, %v633_v10  ;;  %v634_v60 = vadd.f32 %v490_v47, %v186_v40  ;;  %986 = vlog2.f32 %v518_v24  ;;  %v521_v12 = vmul.f32 -0.5, %v977_v59 }
  0x8f   : > { %v981_v0 = vpop.eup %980  ;;  %696 = vst [vmem:[%s1387_s17 + $0x78] sm:$0xff] %v824_v3  ;;  %v499_v52 = vsel %vm1551_vm2, %v496_v54, %v493_v17  ;;  %v256_v37 = vsub.f32 0.0, %v224_v23  ;;  %v257_v1 = vsub.f32 0.0, %v225_v61  ;;  %v189_v30 = vmax.f32 %v1479_v7, 0.0  ;;  %v1641_v23 = vld [vmem:[%s1249_s30 + $0xf0] sm:$0xff]  ;;  %v1644_v3 = vld [vmem:[%s1249_s30 + $0xf8] sm:$0xff] }
  0x90   : > { %v1591_v31 = vpop.eup %982  ;;  %697 = vst [vmem:[%s1387_s17 + $0x80] sm:$0xff] %v825_v25  ;;  %v826_v55 = vadd.f32 -0.6931472, %v634_v60  ;;  %v635_v40 = vadd.f32 %v499_v52, %v187_v35  ;;  %v502_v19 = vmul.f32 0.6931472, %v981_v0  ;;  %v513_v5 = vadd.f32 1.0, %v512_v15 }
  0x91   : > { %v524_v2 = vand.u32 2147483647, %v977_v59  ;;  %v527_v63 = vadd.f32 1.0, %v1591_v31  ;;  %v522_v4 = vadd.f32 1.0, %v521_v12  ;;  %v311_v35 = vmul.f32 1.442695, %v256_v37 }
  0x92   : > { %698 = vst [vmem:[%s1387_s17 + $0x88] sm:$0xff] %v826_v55  ;;  %v827_v46 = vadd.f32 -0.6931472, %v635_v40  ;;  %v508_v22 = vsel %vm1583_vm3, %v505_v16, %v502_v19  ;;  %v190_v7 = vmax.f32 %v1490_v18, 0.0  ;;  %v530_v43 = vmul.f32 -0.5, %v1591_v31  ;;  %v1624_v18 = vld [vmem:[%s1249_s30 + $0xe8] sm:$0xff] }
  0x93   : > { %v636_v38 = vadd.f32 %v508_v22, %v188_v27  ;;  %988 = vlog2.f32 %v527_v63  ;;  %vm1618_vm4 = vcmp.lt.f32.partialorder %v515_v28, 0.0004427343  ;;  %v191_v6 = vmax.f32 %v1504_v50, 0.0 }
  0x94   : > { %699 = vst [vmem:[%s1387_s17 + $0x90] sm:$0xff] %v827_v46  ;;  %990 = vpow2.f32 %v311_v35  ;;  %v313_v27 = vmul.f32 1.442695, %v257_v1  ;;  %v514_v29 = vmul.f32 %v1561_v9, %v513_v5  ;;  %vm1627_vm5 = vcmp.lt.f32.partialorder %v524_v2, 0.0004427343 }
  0x95   : > { %v828_v34 = vadd.f32 -0.6931472, %v636_v38  ;;  %v226_v62 = vand.u32 2147483647, %v1602_v36  ;;  %v523_v53 = vmul.f32 %v977_v59, %v522_v4  ;;  %v227_v20 = vand.u32 2147483647, %v1609_v41 }
  0x96   : > { %v985_v32 = vpop.eup %984  ;;  %992 = vpow2.f32 %v313_v27  ;;  %v228_v50 = vand.u32 2147483647, %v1612_v48  ;;  %v531_v54 = vadd.f32 1.0, %v530_v43  ;;  %v229_v9 = vand.u32 2147483647, %v1615_v56 }
  0x97   : > { %700 = vst [vmem:[%s1387_s17 + $0x98] sm:$0xff] %v828_v34  ;;  %v511_v42 = vmul.f32 0.6931472, %v985_v32  ;;  %v258_v13 = vsub.f32 0.0, %v226_v62  ;;  %v533_v21 = vand.u32 2147483647, %v1591_v31 }
  0x98   : > { %v987_v26 = vpop.eup %986  ;;  %v259_v8 = vsub.f32 0.0, %v227_v20  ;;  %v260_v16 = vsub.f32 0.0, %v228_v50  ;;  %v230_v51 = vand.u32 2147483647, %v1624_v18  ;;  %v261_v33 = vsub.f32 0.0, %v229_v9 }
  0x99   : > { %v517_v59 = vsel %vm1618_vm4, %v514_v29, %v511_v42  ;;  %v520_v11 = vmul.f32 0.6931472, %v987_v26  ;;  %v315_v45 = vmul.f32 1.442695, %v258_v13  ;;  %v532_v17 = vmul.f32 %v1591_v31, %v531_v54 }
  0x9a   : > { %v637_v14 = vadd.f32 %v517_v59, %v189_v30  ;;  %v317_v10 = vmul.f32 1.442695, %v259_v8  ;;  %v319_v24 = vmul.f32 1.442695, %v260_v16  ;;  %v262_v61 = vsub.f32 0.0, %v230_v51 }
  0x9b   : > { %v526_v47 = vsel %vm1627_vm5, %v523_v53, %v520_v11  ;;  %994 = vpow2.f32 %v315_v45  ;;  %v321_v15 = vmul.f32 1.442695, %v261_v33  ;;  %vm1649_vm6 = vcmp.lt.f32.partialorder %v533_v21, 0.0004427343 }
  0x9c   : > { %v829_v25 = vadd.f32 -0.6931472, %v637_v14  ;;  %v638_v60 = vadd.f32 %v526_v47, %v190_v7  ;;  %996 = vpow2.f32 %v317_v10  ;;  %v323_v39 = vmul.f32 1.442695, %v262_v61 }
  0x9d   : > { %v989_v0 = vpop.eup %988  ;;  %998 = vpow2.f32 %v319_v24  ;;  %v231_v28 = vand.u32 2147483647, %v1641_v23  ;;  %v232_v12 = vand.u32 2147483647, %v1644_v3  ;;  %v192_v38 = vmax.f32 %v1556_v58, 0.0 }
  0x9e   : > { %v991_v37 = vpop.eup %990  ;;  %701 = vst [vmem:[%s1387_s17 + $0xa0] sm:$0xff] %v829_v25  ;;  %v830_v31 = vadd.f32 -0.6931472, %v638_v60  ;;  %v529_v55 = vmul.f32 0.6931472, %v989_v0  ;;  %1000 = vpow2.f32 %v321_v15  ;;  %v193_v44 = vmax.f32 %v1559_v49, 0.0 }
  0x9f   : > { %v536_v40 = vadd.f32 1.0, %v991_v37  ;;  %1002 = vpow2.f32 %v323_v39  ;;  %v263_v30 = vsub.f32 0.0, %v231_v28  ;;  %v264_v5 = vsub.f32 0.0, %v232_v12 }
  0xa0   : > { %v993_v19 = vpop.eup %992  ;;  %702 = vst [vmem:[%s1387_s17 + $0xa8] sm:$0xff] %v830_v31  ;;  %v535_v1 = vsel %vm1649_vm6, %v532_v17, %v529_v55  ;;  %v539_v63 = vmul.f32 -0.5, %v991_v37  ;;  %v542_v43 = vand.u32 2147483647, %v991_v37  ;;  %v195_v62 = vmax.f32 %v1609_v41, 0.0 }
  0xa1   : > { %v639_v2 = vadd.f32 %v535_v1, %v191_v6  ;;  %1004 = vlog2.f32 %v536_v40  ;;  %v545_v46 = vadd.f32 1.0, %v993_v19  ;;  %v325_v22 = vmul.f32 1.442695, %v263_v30 }
  0xa2   : > { %v327_v35 = vmul.f32 1.442695, %v264_v5  ;;  %v548_v27 = vmul.f32 -0.5, %v993_v19  ;;  %v540_v29 = vadd.f32 1.0, %v539_v63  ;;  %v194_v6 = vmax.f32 %v1602_v36, 0.0 }
  0xa3   : > { %v831_v4 = vadd.f32 -0.6931472, %v639_v2  ;;  %1006 = vlog2.f32 %v545_v46  ;;  %v196_v58 = vmax.f32 %v1612_v48, 0.0  ;;  %v197_v54 = vmax.f32 %v1615_v56, 0.0 }
  0xa4   : > { %1008 = vpow2.f32 %v325_v22  ;;  %vm1670_vm7 = vcmp.lt.f32.partialorder %v542_v43, 0.0004427343  ;;  %v549_v26 = vadd.f32 1.0, %v548_v27  ;;  %v551_v21 = vand.u32 2147483647, %v993_v19 }
  0xa5   : > { %v995_v7 = vpop.eup %994  ;;  %703 = vst [vmem:[%s1387_s17 + $0xb0] sm:$0xff] %v831_v4  ;;  %1010 = vpow2.f32 %v327_v35  ;;  %v541_v8 = vmul.f32 %v991_v37, %v540_v29  ;;  %v198_v14 = vmax.f32 %v1624_v18, 0.0  ;;  %v199_v56 = vmax.f32 %v1641_v23, 0.0 }
  0xa6   : > { %v997_v34 = vpop.eup %996  ;;  %v554_v57 = vadd.f32 1.0, %v995_v7  ;;  %v557_v53 = vmul.f32 -0.5, %v995_v7  ;;  %v560_v45 = vand.u32 2147483647, %v995_v7  ;;  %v550_v47 = vmul.f32 %v993_v19, %v549_v26 }
  0xa7   : > { %v999_v32 = vpop.eup %998  ;;  %v563_v20 = vadd.f32 1.0, %v997_v34  ;;  %v566_v42 = vmul.f32 -0.5, %v997_v34  ;;  %v569_v33 = vand.u32 2147483647, %v997_v34  ;;  %vm1677_vm8 = vcmp.lt.f32.partialorder %v551_v21, 0.0004427343 }
  0xa8   : > { %v1665_v50 = vpop.eup %1000  ;;  %1012 = vlog2.f32 %v554_v57  ;;  %v572_v49 = vadd.f32 1.0, %v999_v32  ;;  %v575_v16 = vmul.f32 -0.5, %v999_v32  ;;  %v558_v11 = vadd.f32 1.0, %v557_v53 }
  0xa9   : > { %v1668_v13 = vpop.eup %1002  ;;  %1014 = vlog2.f32 %v563_v20  ;;  %v581_v51 = vadd.f32 1.0, %v1665_v50  ;;  %v567_v24 = vadd.f32 1.0, %v566_v42  ;;  %v578_v15 = vand.u32 2147483647, %v999_v32 }
  0xaa   : > { %1016 = vlog2.f32 %v572_v49  ;;  %v590_v61 = vadd.f32 1.0, %v1668_v13  ;;  %v584_v25 = vmul.f32 -0.5, %v1665_v50  ;;  %v576_v0 = vadd.f32 1.0, %v575_v16 }
  0xab   : > { %v1005_v59 = vpop.eup %1004  ;;  %1018 = vlog2.f32 %v581_v51  ;;  %v593_v52 = vmul.f32 -0.5, %v1668_v13  ;;  %vm1687_vm9 = vcmp.lt.f32.partialorder %v560_v45, 0.0004427343  ;;  %v587_v55 = vand.u32 2147483647, %v1665_v50 }
  0xac   : > { %v538_v10 = vmul.f32 0.6931472, %v1005_v59  ;;  %1020 = vlog2.f32 %v590_v61  ;;  %v559_v40 = vmul.f32 %v995_v7, %v558_v11  ;;  %v568_v19 = vmul.f32 %v997_v34, %v567_v24 }
  0xad   : > { %v1007_v60 = vpop.eup %1006  ;;  %vm1692_vm10 = vcmp.lt.f32.partialorder %v569_v33, 0.0004427343  ;;  %vm1701_vm11 = vcmp.lt.f32.partialorder %v578_v15, 0.0004427343  ;;  %v585_v22 = vadd.f32 1.0, %v584_v25  ;;  %v594_v7 = vadd.f32 1.0, %v593_v52 }
  0xae   : > { %v544_v39 = vsel %vm1670_vm7, %v541_v8, %v538_v10  ;;  %v1685_v28 = vpop.eup %1008  ;;  %v547_v37 = vmul.f32 0.6931472, %v1007_v60  ;;  %vm1706_vm12 = vcmp.lt.f32.partialorder %v587_v55, 0.0004427343 }
  0xaf   : > { %v640_v12 = vadd.f32 %v544_v39, %v192_v38  ;;  %v599_v30 = vadd.f32 1.0, %v1685_v28  ;;  %v1697_v5 = vpop.eup %1010  ;;  %v577_v38 = vmul.f32 %v999_v32, %v576_v0  ;;  %v602_v29 = vmul.f32 -0.5, %v1685_v28 }
  0xb0   : > { %v553_v63 = vsel %vm1677_vm8, %v550_v47, %v547_v37  ;;  %v608_v57 = vadd.f32 1.0, %v1697_v5  ;;  %v586_v9 = vmul.f32 %v1665_v50, %v585_v22  ;;  %v595_v16 = vmul.f32 %v1668_v13, %v594_v7 }
  0xb1   : > { %v832_v2 = vadd.f32 -0.6931472, %v640_v12  ;;  %v641_v35 = vadd.f32 %v553_v63, %v193_v44  ;;  %1022 = vlog2.f32 %v599_v30  ;;  %v596_v44 = vand.u32 2147483647, %v1668_v13 }
  0xb2   : > { %v1013_v4 = vpop.eup %1012  ;;  %1024 = vlog2.f32 %v608_v57  ;;  %v611_v51 = vmul.f32 -0.5, %v1697_v5  ;;  %v603_v45 = vadd.f32 1.0, %v602_v29  ;;  %v605_v13 = vand.u32 2147483647, %v1685_v28 }
  0xb3   : > { %v1015_v43 = vpop.eup %1014  ;;  %704 = vst [vmem:[%s1387_s17 + $0xb8] sm:$0xff] %v832_v2  ;;  %v556_v27 = vmul.f32 0.6931472, %v1013_v4  ;;  %v833_v20 = vadd.f32 -0.6931472, %v641_v35  ;;  %v200_v37 = vmax.f32 %v1644_v3, 0.0 }
  0xb4   : > { %v1017_v53 = vpop.eup %1016  ;;  %v565_v42 = vmul.f32 0.6931472, %v1015_v43  ;;  %vm1729_vm13 = vcmp.lt.f32.partialorder %v596_v44, 0.0004427343  ;;  %v612_v48 = vadd.f32 1.0, %v611_v51  ;;  %v604_v17 = vmul.f32 %v1685_v28, %v603_v45 }
  0xb5   : > { %v562_v32 = vsel %vm1687_vm9, %v559_v40, %v556_v27  ;;  %v574_v49 = vmul.f32 0.6931472, %v1017_v53  ;;  %v1019_v26 = vpop.eup %1018  ;;  %705 = vst [vmem:[%s1387_s17 + $0xc0] sm:$0xff] %v833_v20  ;;  %v614_v15 = vand.u32 2147483647, %v1697_v5 }
  0xb6   : > { %v642_v21 = vadd.f32 %v562_v32, %v194_v6  ;;  %v571_v8 = vsel %vm1692_vm10, %v568_v19, %v565_v42  ;;  %v583_v11 = vmul.f32 0.6931472, %v1019_v26  ;;  %v1021_v33 = vpop.eup %1020  ;;  %vm606_vm14 = vcmp.lt.f32.partialorder %v605_v13, 0.0004427343 }
  0xb7   : > { %v643_v59 = vadd.f32 %v571_v8, %v195_v62  ;;  %v580_v50 = vsel %vm1701_vm11, %v577_v38, %v574_v49  ;;  %v592_v24 = vmul.f32 0.6931472, %v1021_v33  ;;  %v613_v52 = vmul.f32 %v1697_v5, %v612_v48 }
  0xb8   : > { %v834_v36 = vadd.f32 -0.6931472, %v642_v21  ;;  %v644_v6 = vadd.f32 %v580_v50, %v196_v58  ;;  %v589_v62 = vsel %vm1706_vm12, %v586_v9, %v583_v11  ;;  %vm615_vm15 = vcmp.lt.f32.partialorder %v614_v15, 0.0004427343 }
  0xb9   : > { %v835_v41 = vadd.f32 -0.6931472, %v643_v59  ;;  %v645_v47 = vadd.f32 %v589_v62, %v197_v54  ;;  %v598_v58 = vsel %vm1729_vm13, %v595_v16, %v592_v24 }
  0xba   : > { %706 = vst [vmem:[%s1387_s17 + $0xc8] sm:$0xff] %v834_v36  ;;  %v836_v61 = vadd.f32 -0.6931472, %v644_v6  ;;  %v646_v39 = vadd.f32 %v598_v58, %v198_v14 }
  0xbb   : > { %707 = vst [vmem:[%s1387_s17 + $0xd0] sm:$0xff] %v835_v41  ;;  %v1023_v25 = vpop.eup %1022  ;;  %v837_v60 = vadd.f32 -0.6931472, %v645_v47 }
  0xbc   : > { %708 = vst [vmem:[%s1387_s17 + $0xd8] sm:$0xff] %v836_v61  ;;  %v601_v54 = vmul.f32 0.6931472, %v1023_v25  ;;  %v838_v0 = vadd.f32 -0.6931472, %v646_v39  ;;  %v1025_v28 = vpop.eup %1024 }
  0xbd   : > { %709 = vst [vmem:[%s1387_s17 + $0xe0] sm:$0xff] %v837_v60  ;;  %v610_v14 = vmul.f32 0.6931472, %v1025_v28 }
  0xbe   : > { %v607_v12 = vsel %vm606_vm14, %v604_v17, %v601_v54  ;;  %710 = vst [vmem:[%s1387_s17 + $0xe8] sm:$0xff] %v838_v0 }
  0xbf   : > { %v647_v18 = vadd.f32 %v607_v12, %v199_v56  ;;  %v616_v31 = vsel %vm615_vm15, %v613_v52, %v610_v14 }
  0xc0   : > { %v648_v55 = vadd.f32 %v616_v31, %v200_v37 }
  0xc1   : > { %v839_v23 = vadd.f32 -0.6931472, %v647_v18 }
  0xc2   : > { %v840_v3 = vadd.f32 -0.6931472, %v648_v55 }
  0xc3   : > { %711 = vst [vmem:[%s1387_s17 + $0xf0] sm:$0xff] %v839_v23 }
  0xc4   : > { %712 = vst [vmem:[%s1387_s17 + $0xf8] sm:$0xff] %v840_v3 }
  0xc5   : > { %1069 = shalt.err (!%p1066_p1)
}
  0xc6   : > { %s1070_s13 = scalar_lea.hbm %s1758_s2, 4096  ;;  %s1074_s20 = scalar_lea.hbm %s1805_s1, 16384 }
  0xc7   : > { %p1071_p3 = scmp.ne.s32.totalorder %s1758_s2, %s1070_s13  ;;  %p1075_p0 = scmp.lt.u32.totalorder %s1758_s2, %s1805_s1 }
  0xc8   : > { %p1076_p2 = scmp.lt.u32.totalorder %s1074_s20, %s1070_s13  ;;  %p1078_p6 = scmp.lt.u32.totalorder %s1070_s13, %s1758_s2 }
  0xc9   : > { %p1072_p4 = pnand %p1071_p3, %p1874_p10 }
  0xca   : > { %p1077_p7 = por %p1076_p2, %p1075_p0 }
  0xcb   : > { %p1073_p5 = pneg %p1072_p4 }
  0xcc   : > { %p1079_p11 = por %p1078_p6, %p1077_p7 }
  0xce   : > { %p1080_p12 = pnand %p1079_p11, %p1073_p5 }
  0xd0   : > { %1083 = shalt.err (!%p1080_p12)
}
  0xd1   : > { %s1128_s24 = smov 128   ;;  %s1129_s26 = smov 8  }
  0xd2   : > { %850 = dma.vmem_to_hbm [thread:$0]  (%p1874_p10), %s1760_s27, 4096, %s1758_s2, %s714_s3, %s1128_s24, %s1128_s24, %s1129_s26  }
  0xd3 PF: > { %p861_p8 = scmp.ge.s32.totalorder %s1122_s9, 2  ;;  %s742_s30 = sand.u32 1, %s1110_s6  }
  0xd4   : > { %p1875_p9 = scmp.ne.s32.totalorder %s1810_s19, 0  ;;  %s743_s17 = scalar_lea.sflag [#allocation4], %s742_s30 }
  0xd6   : > { %p857_p13 = pnand %p861_p8, %p1875_p9 }
  0xd8   : > { %1105 = dma.done.wait (!%p857_p13), %s743_s17, 4096  }
  0xd9   : > { %1107 = vsyncadd (!%p857_p13), %s743_s17, 4294963200  ;;  %p14_p1 = scmp.ge.s32.totalorder %s1165_s12, 6   ;;  %s1876_s6 = smov %s1114_s7 }
  0xda   : > { %s1877_s7 = smov %s1118_s8  ;;  %s1878_s8 = smov %s1177_s15 }
  0xdb   : > { %s1879_s9 = smov %s1165_s12  ;;  %16 = sbr.rel (!%p14_p1) target bundleno = 5 (0x5), region = 69 }
  0xe2   :  { %748 = vsyncpa [#allocation3], 1 }
  0xe3   :  { %750 = vsyncpa [#allocation3 + $0x1], 1 }
  0xe4   :  { %751 = vsyncpa [#allocation4], 1 }
  0xe5   :  { %753 = vsyncpa [#allocation4 + $0x1], 1 }

</bundles_post_ra>
